<compile_context>
chip_gen: v6e
topology: v6e:2x2x1
jax: 0.10.0
libtpu: 0.0.40
codegen_flags: <defaults>
</compile_context>

<pallas_src>
import math

import jax
import jax.numpy as jnp
from jax import lax
from jax.experimental import pallas as pl
from jax.experimental.pallas import tpu as pltpu


# Token-tile candidates: large first (arithmetic intensity of the weight-streaming
# loop ~ tt flops/byte); bf16 packs 2 rows/sublane so keep tt a multiple of 16.
_TT_CANDIDATES_F32 = (512, 384, 256, 128, 64, 32, 16, 8)
_TT_CANDIDATES_SUB32 = (512, 384, 256, 128, 64, 32, 16)
# Hidden (reduction) tile candidates: bigger th halves accumulator RMW traffic and
# per-step pipeline overhead; bounded by the VMEM footprint check below.
_TH_CANDIDATES = (1024, 768, 512, 256, 128)


def _expert_ffn_kernel(x_ref, w1_ref, b1_ref, w2_ref, b2_ref, o_ref, acc_ref):
    h = pl.program_id(2)

    @pl.when(h == 0)
    def _init():
        acc_ref[...] = jnp.zeros_like(acc_ref)

    x = x_ref[0]        # [tt, M]  resident across the H sweep (single-buffered)
    w1 = w1_ref[0]      # [th, M]  native fc1 layout, contiguous HBM slab
    w2 = w2_ref[0]      # [th, O]

    # fc1 chunk: contract M of x against M of w1 ('tm,hm->th'). The MXU consumes
    # the transposed operand directly -- no wrapper transpose, no in-kernel XLU.
    y = lax.dot_general(x, w1, (((1,), (1,)), ((), ())),
                        preferred_element_type=jnp.float32)          # [tt, th] f32

    # fc1 bias row for this H chunk, sliced from the resident per-expert block.
    b1 = b1_ref[0, pl.ds(h, 1), :].astype(jnp.float32)               # [1, th]
    y = jnp.maximum(y + b1, 0.0)

    # fc2 partial sum into the resident f32 accumulator.
    acc_ref[...] += jnp.dot(y.astype(w2.dtype), w2,
                            preferred_element_type=jnp.float32)      # [tt, O] f32

    @pl.when(h == pl.num_programs(2) - 1)
    def _finalize():
        b2 = b2_ref[0].astype(jnp.float32)                           # [1, O]
        o_ref[0] = (acc_ref[...] + b2).astype(o_ref.dtype)


def _itemsize(dt):
    return jnp.dtype(dt).itemsize


def _vmem_budget_bytes():
    """Generation-aware VMEM budget: leave headroom for Mosaic internal scratch.

    v7x has 64 MiB/TC (request ~48 MiB); v5e/v6e have 128 MiB (request ~96 MiB).
    """
    try:
        phys = int(pltpu.get_tpu_info().vmem_capacity_bytes)
    except Exception:
        phys = 64 * 1024 * 1024  # conservative (v7x-sized) fallback
    return min((phys * 3) // 4, 96 * 1024 * 1024)


def _footprint_bytes(tt, th, M, H, O, x_dt, w_dt, out_dt):
    """Approximate VMEM footprint of one grid step for tile choice (tt, th)."""
    xb, wb, ob = _itemsize(x_dt), _itemsize(w_dt), _itemsize(out_dt)
    fp = 0
    fp += 1 * tt * M * xb     # x tile        (single-buffered, h-invariant)
    fp += 2 * th * M * wb     # fc1 weight slab (double-buffered stream)
    fp += 2 * th * O * wb     # fc2 weight slab (double-buffered stream)
    fp += 2 * H * wb          # fc1 bias       (resident per expert)
    fp += 1 * O * wb          # fc2 bias       (single-buffered)
    fp += 2 * tt * O * ob     # output tile    (double-buffered writeback)
    fp += tt * O * 4          # f32 accumulator scratch
    return fp


def fused_experts_forward(x, fc1_w, fc1_b, fc2_w, fc2_b, *, tt=None, th=None):
    """x: [E, T, M]; fc1_w: [E, H, M]; fc1_b: [E, H]; fc2_w: [E, H, O]; fc2_b: [E, O]."""
    E, T, M = x.shape
    Ew, H, Mw = fc1_w.shape
    O = fc2_w.shape[-1]
    assert (Ew, Mw) == (E, M), (fc1_w.shape, x.shape)
    assert fc2_w.shape == (E, H, O), fc2_w.shape
    assert fc1_b.shape == (E, H) and fc2_b.shape == (E, O)

    x_dt, w_dt = x.dtype, fc1_w.dtype
    vmem_limit = _vmem_budget_bytes()

    # bf16 (and narrower) packs >=2 rows per sublane -> token tiles multiple of 16.
    base = 16 if _itemsize(x_dt) < 4 else 8
    # Pad ragged token counts to the tile base (zero rows are sliced off at the end)
    # instead of falling back to a full-T resident block.
    T_pad = ((T + base - 1) // base) * base
    if T_pad != T:
        x = jnp.pad(x, ((0, 0), (0, T_pad - T), (0, 0)))

    tt_cands = _TT_CANDIDATES_SUB32 if base == 16 else _TT_CANDIDATES_F32
    tt_opts = [c for c in tt_cands if c <= T_pad and T_pad % c == 0] or [T_pad]
    th_opts = [c for c in _TH_CANDIDATES if c <= H and H % c == 0] or [H]

    tt_given, th_given = tt is not None, th is not None
    if not (tt_given and th_given):
        tt_search = [tt] if tt_given else tt_opts
        th_search = [th] if th_given else th_opts
        best = None
        for ct in tt_search:                       # prefer the largest token tile,
            for ch in th_search:                   # then the largest reduction tile
                if _footprint_bytes(ct, ch, M, H, O, x_dt, w_dt, x_dt) <= vmem_limit:
                    best = (ct, ch)
                    break
            if best is not None:
                break
        if best is None:  # nothing fits the estimate; take the smallest tiles
            best = (tt_search[-1], th_search[-1])
        tt, th = best
        # v7x has 2 TensorCores: keep >= 2 "parallel" grid tiles when possible.
        if not tt_given and E * (T_pad // tt) < 2:
            for ct in tt_opts:
                if (T_pad // ct >= 2 and
                        _footprint_bytes(ct, th, M, H, O, x_dt, w_dt, x_dt) <= vmem_limit):
                    tt = ct
                    break

    # Floor-division grids silently drop tails -- guard explicitly.
    assert T_pad % tt == 0, f"token tile {tt} must divide (padded) T={T_pad}"
    assert H % th == 0, f"hidden tile {th} must divide H={H}"

    # Bias layout: fc1 bias as [E, H//th, th] so the kernel slices row h from a
    # resident block; fc2 bias broadcast-ready as [E, 1, O].
    fc1_b3 = fc1_b.reshape(E, H // th, th)
    fc2_b3 = fc2_b.reshape(E, 1, O)

    grid = (E, T_pad // tt, H // th)

    out = pl.pallas_call(
        _expert_ffn_kernel,
        out_shape=jax.ShapeDtypeStruct((E, T_pad, O), x.dtype),
        grid_spec=pltpu.PrefetchScalarGridSpec(
            num_scalar_prefetch=0,
            grid=grid,
            in_specs=[
                # x tile: indexed on (e, t) only -> resident across the H sweep;
                # single-buffered (never refilled mid-sweep) to save VMEM.
                pl.BlockSpec((1, tt, M), lambda e, t, h: (e, t, 0),
                             pipeline_mode=pl.Buffered(1)),
                # fc1 weight slab [th, M] in native layout: contiguous stream over H.
                pl.BlockSpec((1, th, M), lambda e, t, h: (e, h, 0)),
                # fc1 bias: full per-expert block, resident (row sliced in-kernel).
                pl.BlockSpec((1, H // th, th), lambda e, t, h: (e, 0, 0)),
                # fc2 weight slab [th, O]: streams over H.
                pl.BlockSpec((1, th, O), lambda e, t, h: (e, h, 0)),
                # fc2 bias [1, O]: resident per expert, single-buffered.
                pl.BlockSpec((1, 1, O), lambda e, t, h: (e, 0, 0),
                             pipeline_mode=pl.Buffered(1)),
            ],
            # Output indexed on (e, t) only -> accumulator-resident across H;
            # kept double-buffered so writeback overlaps the next tile's sweep.
            out_specs=pl.BlockSpec((1, tt, O), lambda e, t, h: (e, t, 0)),
            scratch_shapes=[pltpu.VMEM((tt, O), jnp.float32)],
        ),
        compiler_params=pltpu.CompilerParams(
            dimension_semantics=("parallel", "parallel", "arbitrary"),
            vmem_limit_bytes=vmem_limit,
        ),
    )(x, fc1_w, fc1_b3, fc2_w, fc2_b3)

    return out[:, :T, :] if T_pad != T else out


def init_params(key, num_experts, model_dim, hidden_size_per_expert,
                sharded_count=1, output_dim=None, dtype=jnp.float32):
    """Deterministic init mirroring FusedExpertsNetwork.reset_parameters:
       fc1_w, fc2_w ~ U(-stdv, stdv); biases zeroed."""
    output_dim = output_dim or model_dim
    hidden_size = hidden_size_per_expert // sharded_count
    fc1_stdv = 1.0 / math.sqrt(model_dim)     # 1/sqrt(fc1_w.size(-1))
    fc2_stdv = 1.0 / math.sqrt(hidden_size)   # 1/sqrt(fc2_w.size(-2))
    k1, k2 = jax.random.split(key)
    fc1_w = jax.random.uniform(
        k1, (num_experts, hidden_size, model_dim),
        minval=-fc1_stdv, maxval=fc1_stdv, dtype=jnp.float32).astype(dtype)
    fc2_w = jax.random.uniform(
        k2, (num_experts, hidden_size, output_dim),
        minval=-fc2_stdv, maxval=fc2_stdv, dtype=jnp.float32).astype(dtype)
    fc1_b = jnp.zeros((num_experts, hidden_size), dtype)
    fc2_b = jnp.zeros(
        (num_experts, (output_dim + sharded_count - 1) // sharded_count), dtype)
    return fc1_w, fc1_b, fc2_w, fc2_b


def reference_forward(x, fc1_w, fc1_b, fc2_w, fc2_b):
    y = jnp.matmul(x, jnp.transpose(fc1_w, (0, 2, 1)))
    y = y + fc1_b[:, None, :]
    y = jnp.maximum(y, 0.0)
    y = jnp.matmul(y, fc2_w)
    y = y + fc2_b[:, None, :]
    return y


if __name__ == "__main__":
    # Small but (8,128)-aligned config: 2 experts, 16 tokens/expert,
    # model_dim=128, hidden_size_per_expert=256, output_dim=model_dim.
    E, T, M, H = 2, 16, 128, 256
    key = jax.random.PRNGKey(0)
    kx, kp, kb1, kb2 = jax.random.split(key, 4)

    x = jax.random.normal(kx, (E, T, M), dtype=jnp.float32)
    fc1_w, fc1_b, fc2_w, fc2_b = init_params(
        kp, num_experts=E, model_dim=M, hidden_size_per_expert=H)
    # Module init zeroes biases; use small random biases here to exercise the
    # bias-add paths in the kernel.
    fc1_b = 0.01 * jax.random.normal(kb1, fc1_b.shape, dtype=jnp.float32)
    fc2_b = 0.01 * jax.random.normal(kb2, fc2_b.shape, dtype=jnp.float32)

    ref = reference_forward(x, fc1_w, fc1_b, fc2_w, fc2_b)
    O = fc2_w.shape[-1]

    # 1) Explicit small tiles: exercises token tiling, the H-reduction axis
    #    (grid = (2, 2, 2)) and the resident fc1-bias row slicing.
    out = jax.block_until_ready(
        fused_experts_forward(x, fc1_w, fc1_b, fc2_w, fc2_b, tt=8, th=128))
    assert out.shape == (E, T, O), (out.shape, (E, T, O))
    assert jnp.allclose(out, ref, atol=1e-4, rtol=1e-4), "mismatch (tiled) vs reference"

    # 2) Auto, VMEM-aware tile selection.
    out2 = jax.block_until_ready(fused_experts_forward(x, fc1_w, fc1_b, fc2_w, fc2_b))
    assert jnp.allclose(out2, ref, atol=1e-4, rtol=1e-4), "mismatch (auto) vs reference"

    # 3) Ragged token count -> zero-padded to the tile base and sliced back.
    Tr = 12
    xr = x[:, :Tr, :]
    refr = reference_forward(xr, fc1_w, fc1_b, fc2_w, fc2_b)
    outr = jax.block_until_ready(fused_experts_forward(xr, fc1_w, fc1_b, fc2_w, fc2_b))
    assert outr.shape == (E, Tr, O), (outr.shape, (E, Tr, O))
    assert jnp.allclose(outr, refr, atol=1e-4, rtol=1e-4), "mismatch (ragged) vs reference"

    print("KERNEL_OK")
</pallas_src>

<mosaic_0001>
module attributes {stable_mosaic.version = 11 : i64} {
  func.func @_expert_ffn_kernel(%arg0: i32, %arg1: i32, %arg2: i32, %arg3: memref<1x8x128xf32, #tpu.memory_space<vmem>>, %arg4: memref<1x128x128xf32, #tpu.memory_space<vmem>>, %arg5: memref<1x2x128xf32, #tpu.memory_space<vmem>>, %arg6: memref<1x128x128xf32, #tpu.memory_space<vmem>>, %arg7: memref<1x1x128xf32, #tpu.memory_space<vmem>>, %arg8: memref<1x8x128xf32, #tpu.memory_space<vmem>>, %arg9: memref<8x128xf32, #tpu.memory_space<vmem>>) attributes {dimension_semantics = [#tpu.dimension_semantics<parallel>, #tpu.dimension_semantics<parallel>, #tpu.dimension_semantics<arbitrary>], iteration_bounds = array<i64: 2, 2, 2>, scalar_prefetch = 0 : i64, scratch_operands = 1 : i64, tpu.core_type = #tpu.core_type<tc>, window_params = [{pipeline_mode = #tpu.pipeline_mode<synchronous>, transform_indices = @transform_0, window_bounds = array<i64: 1, 8, 128>}, {transform_indices = @transform_1, window_bounds = array<i64: 1, 128, 128>}, {transform_indices = @transform_2, window_bounds = array<i64: 1, 2, 128>}, {transform_indices = @transform_3, window_bounds = array<i64: 1, 128, 128>}, {pipeline_mode = #tpu.pipeline_mode<synchronous>, transform_indices = @transform_4, window_bounds = array<i64: 1, 1, 128>}, {transform_indices = @transform_5, window_bounds = array<i64: 1, 8, 128>}]} {
    %c0_i32 = arith.constant 0 : i32
    %0 = arith.cmpi eq, %arg2, %c0_i32 : i32
    %1 = arith.extui %0 : i1 to i32
    %c0_i32_0 = arith.constant 0 : i32
    %2 = arith.cmpi ne, %1, %c0_i32_0 : i32
    scf.if %2 {
      %cst_18 = arith.constant 0.000000e+00 : f32
      %24 = vector.broadcast %cst_18 : f32 to vector<8x128xf32>
      %c0_19 = arith.constant 0 : index
      %c0_20 = arith.constant 0 : index
      %25 = vector.load %arg9[%c0_19, %c0_20] : memref<8x128xf32, #tpu.memory_space<vmem>>, vector<8x128xf32>
      tpu.vector_store %arg9[%c0_19, %c0_20], %24 {strides = array<i32>} : memref<8x128xf32, #tpu.memory_space<vmem>>, vector<8x128xf32>,
    } else {
    }
    %c0 = arith.constant 0 : index
    %c0_1 = arith.constant 0 : index
    %c0_2 = arith.constant 0 : index
    %3 = vector.load %arg3[%c0, %c0_1, %c0_2] : memref<1x8x128xf32, #tpu.memory_space<vmem>>, vector<1x8x128xf32>
    %4 = vector.shape_cast %3 : vector<1x8x128xf32> to vector<8x128xf32>
    %c0_3 = arith.constant 0 : index
    %c0_4 = arith.constant 0 : index
    %c0_5 = arith.constant 0 : index
    %5 = vector.load %arg4[%c0_3, %c0_4, %c0_5] : memref<1x128x128xf32, #tpu.memory_space<vmem>>, vector<1x128x128xf32>
    %6 = vector.shape_cast %5 : vector<1x128x128xf32> to vector<128x128xf32>
    %c0_6 = arith.constant 0 : index
    %c0_7 = arith.constant 0 : index
    %c0_8 = arith.constant 0 : index
    %7 = vector.load %arg6[%c0_6, %c0_7, %c0_8] : memref<1x128x128xf32, #tpu.memory_space<vmem>>, vector<1x128x128xf32>
    %8 = vector.shape_cast %7 : vector<1x128x128xf32> to vector<128x128xf32>
    %cst = arith.constant dense<0.000000e+00> : vector<8x128xf32>
    %9 = tpu.matmul %4, %6, %cst {dimension_numbers = #tpu.dot_dimension_numbers<[1], [1], [0], [0], [0, 0, 1, 0], [], []>} : vector<8x128xf32>, vector<128x128xf32>, vector<8x128xf32> -> vector<8x128xf32>
    %c0_9 = arith.constant 0 : index
    %10 = arith.index_cast %arg2 : i32 to index
    %c0_10 = arith.constant 0 : index
    %11 = vector.load %arg5[%c0_9, %10, %c0_10] : memref<1x2x128xf32, #tpu.memory_space<vmem>>, vector<1x1x128xf32>
    %12 = vector.shape_cast %11 : vector<1x1x128xf32> to vector<1x128xf32>
    %13 = vector.broadcast %12 : vector<1x128xf32> to vector<8x128xf32>
    %14 = arith.addf %9, %13 : vector<8x128xf32>
    %cst_11 = arith.constant 0.000000e+00 : f32
    %15 = vector.broadcast %cst_11 : f32 to vector<8x128xf32>
    %16 = arith.maximumf %14, %15 : vector<8x128xf32>
    %c0_12 = arith.constant 0 : index
    %c0_13 = arith.constant 0 : index
    %17 = vector.load %arg9[%c0_12, %c0_13] : memref<8x128xf32, #tpu.memory_space<vmem>>, vector<8x128xf32>
    %cst_14 = arith.constant dense<0.000000e+00> : vector<8x128xf32>
    %18 = tpu.matmul %16, %8, %cst_14 {dimension_numbers = #tpu.dot_dimension_numbers<[1], [0], [0], [1], [0, 0, 1, 1], [], []>} : vector<8x128xf32>, vector<128x128xf32>, vector<8x128xf32> -> vector<8x128xf32>
    %19 = arith.addf %17, %18 : vector<8x128xf32>
    %c0_15 = arith.constant 0 : index
    %c0_16 = arith.constant 0 : index
    %20 = vector.load %arg9[%c0_15, %c0_16] : memref<8x128xf32, #tpu.memory_space<vmem>>, vector<8x128xf32>
    tpu.vector_store %arg9[%c0_15, %c0_16], %19 {strides = array<i32>} : memref<8x128xf32, #tpu.memory_space<vmem>>, vector<8x128xf32>,
    %c1_i32 = arith.constant 1 : i32
    %21 = arith.cmpi eq, %arg2, %c1_i32 : i32
    %22 = arith.extui %21 : i1 to i32
    %c0_i32_17 = arith.constant 0 : i32
    %23 = arith.cmpi ne, %22, %c0_i32_17 : i32
    scf.if %23 {
      %c0_18 = arith.constant 0 : index
      %c0_19 = arith.constant 0 : index
      %c0_20 = arith.constant 0 : index
      %24 = vector.load %arg7[%c0_18, %c0_19, %c0_20] : memref<1x1x128xf32, #tpu.memory_space<vmem>>, vector<1x1x128xf32>
      %25 = vector.shape_cast %24 : vector<1x1x128xf32> to vector<1x128xf32>
      %c0_21 = arith.constant 0 : index
      %c0_22 = arith.constant 0 : index
      %26 = vector.load %arg9[%c0_21, %c0_22] : memref<8x128xf32, #tpu.memory_space<vmem>>, vector<8x128xf32>
      %27 = vector.broadcast %25 : vector<1x128xf32> to vector<8x128xf32>
      %28 = arith.addf %26, %27 : vector<8x128xf32>
      %c0_23 = arith.constant 0 : index
      %c0_24 = arith.constant 0 : index
      %c0_25 = arith.constant 0 : index
      %29 = vector.load %arg8[%c0_23, %c0_24, %c0_25] : memref<1x8x128xf32, #tpu.memory_space<vmem>>, vector<1x8x128xf32>
      %30 = vector.shape_cast %29 : vector<1x8x128xf32> to vector<8x128xf32>
      %31 = vector.shape_cast %28 : vector<8x128xf32> to vector<1x8x128xf32>
      tpu.vector_store %arg8[%c0_23, %c0_24, %c0_25], %31 {strides = array<i32>} : memref<1x8x128xf32, #tpu.memory_space<vmem>>, vector<1x8x128xf32>,
    } else {
    }
    return
  }
  func.func @transform_0(%arg0: i32, %arg1: i32, %arg2: i32) -> (i32, i32, i32) {
    %c0_i32 = arith.constant 0 : i32
    %c0_i32_0 = arith.constant 0 : i32
    return %arg0, %arg1, %c0_i32 : i32, i32, i32
  }
  func.func @transform_1(%arg0: i32, %arg1: i32, %arg2: i32) -> (i32, i32, i32) {
    %c0_i32 = arith.constant 0 : i32
    %c0_i32_0 = arith.constant 0 : i32
    return %arg0, %arg2, %c0_i32 : i32, i32, i32
  }
  func.func @transform_2(%arg0: i32, %arg1: i32, %arg2: i32) -> (i32, i32, i32) {
    %c0_i32 = arith.constant 0 : i32
    %c0_i32_0 = arith.constant 0 : i32
    %c0_i32_1 = arith.constant 0 : i32
    return %arg0, %c0_i32, %c0_i32_0 : i32, i32, i32
  }
  func.func @transform_3(%arg0: i32, %arg1: i32, %arg2: i32) -> (i32, i32, i32) {
    %c0_i32 = arith.constant 0 : i32
    %c0_i32_0 = arith.constant 0 : i32
    return %arg0, %arg2, %c0_i32 : i32, i32, i32
  }
  func.func @transform_4(%arg0: i32, %arg1: i32, %arg2: i32) -> (i32, i32, i32) {
    %c0_i32 = arith.constant 0 : i32
    %c0_i32_0 = arith.constant 0 : i32
    %c0_i32_1 = arith.constant 0 : i32
    return %arg0, %c0_i32, %c0_i32_0 : i32, i32, i32
  }
  func.func @transform_5(%arg0: i32, %arg1: i32, %arg2: i32) -> (i32, i32, i32) {
    %c0_i32 = arith.constant 0 : i32
    %c0_i32_0 = arith.constant 0 : i32
    return %arg0, %arg1, %c0_i32 : i32, i32, i32
  }
}

</mosaic_0001>

<bundles_post_ra>
// kernel: tpu_custom_call.1
= control target key start
LH: loop header
LB: loop body
LE: loop exit
PB: predicated region body
PF: predicated region fallthrough
CT: control target
= control target key end

     0   :  { %s1879_s0 = inlined_call_operand.hbm [shape: f32[2,16,128], index: 0, kind: input, shape index: {}]   ;;  %s1880_s1 = inlined_call_operand.hbm [shape: f32[2,256,128], index: 1, kind: input, shape index: {}]   ;;  %s1881_s2 = inlined_call_operand.hbm [shape: f32[2,2,128], index: 2, kind: input, shape index: {}]   ;;  %s1882_s3 = inlined_call_operand.hbm [shape: f32[2,256,128], index: 3, kind: input, shape index: {}]   ;;  %s1883_s4 = inlined_call_operand.vmem [shape: f32[2,1,128], index: 4, kind: input, shape index: {}]   ;;  %s1884_s5 = inlined_call_operand.hbm [shape: f32[2,16,128], index: 5, kind: output, shape index: {}]  }
   0x1   :  { %1919 = sst [smem:[#allocation31_spill]] %s1879_s0 }
   0x2   :  { %1920 = sst [smem:[#allocation32_spill]] %s1880_s1 }
   0x3   :  { %1921 = sst [smem:[#allocation33_spill]] %s1881_s2 }
   0x4   :  { %1922 = sst [smem:[#allocation34_spill]] %s1882_s3 }
   0x5   :  { %1923 = sst [smem:[#allocation35_spill]] %s1883_s4 }
   0x6   :  { %1924 = sst [smem:[#allocation36_spill]] %s1884_s5 }
   0x7   :  { %10 = vsyncpa [#allocation4], 0 }
   0x8   :  { %11 = vsyncpa [#allocation7], 0 }
   0x9   :  { %13 = vsyncpa [#allocation7 + $0x1], 0 }
   0xa   :  { %14 = vsyncpa [#allocation10], 0 }
   0xb   :  { %16 = vsyncpa [#allocation10 + $0x1], 0 }
   0xc   :  { %17 = vsyncpa [#allocation5], 0 }
   0xd   :  { %19 = vsyncpa [#allocation5 + $0x1], 0  ;;  %s1395_s18 = smov 0   ;;  %s1397_s19 = smov 0  }
   0xe   :  { %s1399_s20 = smov 0   ;;  %s1401_s21 = smov 0  }
   0xf   :  { %s1403_s22 = smov 0   ;;  %s1405_s23 = smov 0  }
  0x10   :  { %s1407_s24 = smov 0   ;;  %s1409_s25 = smov 0  }
  0x11   :  { %s1411_s26 = smov 0   ;;  %s1413_s27 = smov 0  }
  0x12   :  { %s1415_s28 = smov 0   ;;  %s1417_s29 = smov 0  }
  0x13   :  { %s1419_s30 = smov 0   ;;  %s1421_s6 = smov 0  }
  0x14   :  { %s1423_s7 = smov 0   ;;  %s1425_s8 = smov 0  }
  0x15 LB: > { %1925 = sst [smem:[#allocation17_spill]] %s1301_s20  ;;  %s37_s9 = sadd.s32 1, %s1341_s30  ;;  %s1353_s8 = sphi %s1425_s8, %s25_s8   ;;  %s1349_s7 = sphi %s1423_s7, %s2001_s7   ;;  %s1345_s6 = sphi %s1421_s6, %s1991_s6   ;;  %s1341_s30 = sphi %s1419_s30, %s1990_s30   ;;  %s1337_s29 = sphi %s1417_s29, %s1989_s29   ;;  %s1333_s28 = sphi %s1415_s28, %s1988_s28   ;;  %s1329_s27 = sphi %s1413_s27, %s1987_s27   ;;  %s1325_s26 = sphi %s1411_s26, %s1986_s26   ;;  %s1321_s25 = sphi %s1409_s25, %s2000_s25   ;;  %s1317_s24 = sphi %s1407_s24, %s1999_s24   ;;  %s1313_s23 = sphi %s1405_s23, %s1998_s23   ;;  %s1309_s22 = sphi %s1403_s22, %s1997_s22   ;;  %s1305_s21 = sphi %s1401_s21, %s1996_s21   ;;  %s1301_s20 = sphi %s1399_s20, %s1643_s20   ;;  %s1297_s19 = sphi %s1397_s19, %s1995_s19   ;;  %s1293_s18 = sphi %s1395_s18, %s1993_s18  }
  0x16   : > { %1926 = sst [smem:[#allocation18_spill]] %s1317_s24  ;;  %s40_s10 = sadd.s32 1, %s1345_s6 }
  0x17   : > { %1927 = sst [smem:[#allocation19_spill]] %s1325_s26  ;;  %p38_p0 = scmp.ge.s32.totalorder %s37_s9, 2 }
  0x18   : > { %1928 = sst [smem:[#allocation20_spill]] %s1329_s27  ;;  %s44_s11 = sadd.s32 1, %s1349_s7 }
  0x19   : > { %1929 = sst [smem:[#allocation21_spill]] %s1333_s28  ;;  %s81_s12 = sadd.s32 1, %s1313_s23 }
  0x1a   : > { %1930 = sst [smem:[#allocation22_spill]] %s1341_s30  ;;  %p88_p1 = scmp.ne.s32.totalorder %s1313_s23, %s1309_s22 }
  0x1b   : > { %1931 = sst [smem:[#allocation23_spill]] %s1345_s6  ;;  %s2003_s9 = smov (%p38_p0, %s37_s9), 0 }
  0x1c   : > { %1932 = sst [smem:[#allocation24_spill]] %s1349_s7  ;;  %s2005_s10 = smov (!%p38_p0, %s40_s10), %s1345_s6 }
  0x1d   : > { %1933 = sst [smem:[#allocation25_spill]] %s2003_s9  ;;  %s77_s13 = ssub.s32 %s1341_s30, %s2003_s9 }
  0x1e   : > { %p1898_p2 = scmp.eq.s32.totalorder %s1353_s8, 0  ;;  %p42_p3 = scmp.ge.s32.totalorder %s2005_s10, 2 }
  0x1f   : > { %p1897_p5 = scmp.lt.s32.totalorder %s1353_s8, 8  ;;  %s247_s15 = sand.u32 1, %s1353_s8  }
  0x20   : > { %p1492_p4 = por %p1898_p2, %p88_p1  ;;  %s2007_s11 = smov (!%p42_p3, %s44_s11), %s1349_s7 }
  0x21   : > { %s1888_s16 = sand.u32 1, %s1313_s23   ;;  %p46_p6 = scmp.ge.s32.totalorder %s2007_s11, 2 }
  0x22   : > { %s1504_s17 = sshll.u32 %s1888_s16, 7  ;;  %s778_s9 = sshll.u32 %s1341_s30, 4 }
  0x23   : > { %s2009_s11 = smov (%p46_p6, %s2007_s11), 0  ;;  %s1901_s5 = sshll.u32 %s1349_s7, 5 }
  0x24   : > { %1935 = sst [smem:[#allocation26_spill]] %s2009_s11  ;;  %s1512_s27 = ssub.s32 %s1349_s7, %s2009_s11 }
  0x25   : > { %s1516_s4 = sadd.s32 %s1901_s5, %s778_s9  ;;  %s78_s3 = sor.u32 %s77_s13, %s1512_s27 }
  0x26   : > { %s1895_s2 = sshll.u32 %s1516_s4, 7  ;;  %p79_p7 = scmp.eq.s32.totalorder %s78_s3, 0 }
  0x27   : > { %s1936_s1 = sld [smem:[#allocation32_spill]]  ;;  %s251_s0 = scalar_lea.vmem [#allocation6], %s1504_s17 }
  0x28   : > { %s260_s28 = sshll.u32 %s251_s0, 4  ;;  %p1530_p8 = pnand %p1897_p5, %p1492_p4  ;;  %s261_s28 = int_to_ptr.vmem [resolvable:$true] %s260_s28 }
  0x29   : > { %s1535_s9 = scalar_select %p79_p7, %s1313_s23, %s81_s12  }
  0x2a   : > { %s1937_s11 = scalar_select %p1530_p8, 1, 0 }
  0x2b   : > { %1938 = sst [smem:[#allocation27_spill]] %s1535_s9  ;;  %s1537_s13 = scalar_lea.sflag [#allocation7], %s247_s15 }
  0x2c   : > { %p1896_p9 = pneg %p1530_p8  ;;  %s1082_s3 = scalar_lea.vmem %s261_s28, 2048 }
  0x2d   : > { %s259_s30 = scalar_lea.hbm %s1936_s1, %s1895_s2  ;;  %p1083_p10 = scmp.ne.s32.totalorder %s261_s28, %s1082_s3 }
  0x2e   : > { %s1355_s0 = smov [#allocation6]  }
  0x2f   : > { %p1085_p11 = pnand %p1083_p10, %p1896_p9  ;;  %s1087_s20 = sshll.u32 %s1355_s0, 4  ;;  %s1088_s20 = int_to_ptr.vmem [resolvable:$false] %s1087_s20 }
  0x30   : > { %s1089_s14 = scalar_lea.vmem %s1088_s20, 4096  ;;  %p1090_p13 = scmp.lt.s32.totalorder %s261_s28, %s1088_s20 }
  0x31   : > { %p1086_p12 = pneg %p1085_p11  ;;  %p1091_p0 = scmp.lt.s32.totalorder %s1089_s14, %s1082_s3 }
  0x33   : > { %p1092_p1 = por %p1091_p0, %p1090_p13 }
  0x35   : > { %p1093_p4 = pnand %p1092_p1, %p1086_p12 }
  0x37   : > { %1096 = shalt.err (!%p1093_p4)
}
  0x38   : > { %s1893_s12 = smov 128   ;;  %s1894_s15 = smov 8  }
  0x39   : > { %922 = dma.hbm_to_vmem [thread:$0]  (!%p1530_p8), %s259_s30, 2048, %s261_s28, %s1537_s13, %s1893_s12, %s1893_s12, %s1894_s15  }
  0x3a   : > { %s1551_s16 = sadd.s32 4294967295, %s1353_s8   ;;  %s772_s3 = sadd.s32 4294967294, %s1353_s8  }
  0x3b   : > { %s2011_s10 = smov (%p42_p3, %s2005_s10), 0  ;;  %s53_s0 = sadd.s32 1, %s1325_s26 }
  0x3c   : > { %1939 = sst [smem:[#allocation28_spill]] %s2011_s10  ;;  %p1899_p6 = scmp.ne.s32.totalorder %s1321_s25, %s1317_s24 }
  0x3d   : > { %s49_s20 = ssub.s32 %s1345_s6, %s2011_s10  ;;  %p67_p7 = scmp.eq.s32.totalorder %s1551_s16, 0 }
  0x3e   : > { %s50_s28 = sor.u32 %s49_s20, %s1512_s27  ;;  %p94_p10 = scmp.ne.s32.totalorder %s1309_s22, %s1305_s21 }
  0x3f   : > { %s1940_s30 = sld [smem:[#allocation21_spill]]  ;;  %p51_p11 = scmp.eq.s32.totalorder %s50_s28, 0 }
  0x40   : > { %p1571_p12 = por %p67_p7, %p1899_p6  ;;  %p1575_p3 = por %p94_p10, %p67_p7 }
  0x41   : > { %p120_p13 = scmp.ne.s32.totalorder %s1297_s19, %s1293_s18  ;;  %p199_p1 = scmp.ne.s32.totalorder %s1325_s26, %s1321_s25 }
  0x42   : > { %s1941_s14 = scalar_select %p1571_p12, 1, 0 }
  0x43   : > { %s1942_s12 = scalar_select %p1575_p3, 1, 0 }
  0x44   : > { %s1582_s15 = scalar_select %p51_p11, %s1325_s26, %s53_s0  }
  0x45   : > { %p1584_p0 = por %p120_p13, %p67_p7  ;;  %p200_p4 = scmp.eq.s32.totalorder %s1551_s16, 7 }
  0x46   : > { %1943 = sst [smem:[#allocation29_spill]] %s1582_s15  ;;  %p206_p9 = scmp.eq.s32.totalorder %s772_s3, 7 }
  0x47   : > { %s1944_s2 = scalar_select %p1584_p0, 1, 0 }
  0x48   : > { %p773_p5 = scmp.ge.s32.totalorder %s1353_s8, 1  ;;  %p213_p2 = scmp.lt.s32.totalorder %s1353_s8, 9 }
  0x49   : > { %p1593_p6 = por %p200_p4, %p199_p1  ;;  %p1947_p10 = scmp.ne.s32.totalorder %s1321_s25, %s1317_s24 }
  0x4a   : > { %p1604_p7 = pnand %p773_p5, %p213_p2  ;;  %s774_s20 = sshll.u32 %s1337_s29, 1 }
  0x4b   : > { %s1945_s21 = scalar_select %p1593_p6, 1, 0 }
  0x4c   : > { %p1600_p3 = por %p206_p9, %p1947_p10  ;;  %s1610_s28 = sadd.s32 %s1940_s30, %s774_s20 }
  0x4d   : > { %1946 = sst [smem:[#allocation21_spill]] %s1945_s21  ;;  %p915_p11 = pneg %p1604_p7 }
  0x4e   : > { %s1948_s18 = scalar_select %p1600_p3, 1, 0 }
  0x4f   : > { %s1950_s0 = scalar_select %p1604_p7, 1, 0 }
  0x50   : > { %1949 = sst [smem:[#allocation30_spill]] %s1948_s18  ;;  %s1907_s3 = sshll.u32 %s1610_s28, 7 }
  0x51   : > { %s1951_s10 = sld [smem:[#allocation31_spill]]  ;;  %s1358_s15 = smov [#allocation3]  }
  0x52   : > { %s230_s26 = sshll.u32 %s1358_s15, 4  ;;  %p1622_p2 = pnand %p915_p11, %p1571_p12  ;;  %s231_s26 = int_to_ptr.vmem [resolvable:$true] %s230_s26 }
  0x54   : > { %p1099_p13 = pneg %p1622_p2 }
  0x57   : > { %s228_s6 = scalar_lea.hbm %s1951_s10, %s1907_s3  ;;  %s1102_s1 = scalar_lea.hbm %s1951_s10, 512 }
  0x58   : > { %s1097_s30 = scalar_lea.hbm %s228_s6, 128  ;;  %p1103_p10 = scmp.lt.s32.totalorder %s228_s6, %s1951_s10 }
  0x59   : > { %p1098_p9 = scmp.ne.s32.totalorder %s228_s6, %s1097_s30  ;;  %p1104_p11 = scmp.lt.s32.totalorder %s1102_s1, %s1097_s30 }
  0x5b   : > { %p1100_p1 = pnand %p1099_p13, %p1098_p9  ;;  %p1105_p3 = por %p1104_p11, %p1103_p10 }
  0x5d   : > { %p1101_p4 = pneg %p1100_p1 }
  0x5f   : > { %p1106_p6 = pnand %p1105_p3, %p1101_p4 }
  0x61   : > { %1109 = shalt.err (!%p1106_p6)
}
  0x62   : > { %s1110_s3 = scalar_lea.vmem %s231_s26, 128  ;;  %p1118_p7 = scmp.lt.s32.totalorder %s231_s26, %s231_s26 }
  0x63   : > { %p1111_p5 = scmp.ne.s32.totalorder %s231_s26, %s1110_s3  ;;  %p1119_p8 = scmp.lt.s32.totalorder %s1110_s3, %s1110_s3 }
  0x65   : > { %p1113_p0 = pnand %p1111_p5, %p1099_p13  ;;  %p1120_p9 = por %p1119_p8, %p1118_p7 }
  0x67   : > { %p1114_p12 = pneg %p1113_p0 }
  0x69   : > { %p1121_p1 = pnand %p1120_p9, %p1114_p12 }
  0x6b   : > { %1124 = shalt.err (!%p1121_p1)
}
  0x6c   : > { %s1953_s18 = sld [smem:[#allocation17_spill]]  ;;  %p1954_p3 = scmp.eq.s32.totalorder %s1512_s27, 0 }
  0x6d   : > { %918 = dma.hbm_to_vmem [thread:$0]  (!%p1622_p2), %s228_s6, 128, %s231_s26, [#allocation4]  }
  0x6e   : > { %p1955_p8 = scmp.eq.s32.totalorder %s1353_s8, 0  ;;  %s1956_s9 = sshll.u32 %s1349_s7, 5 }
  0x6f   : > { %s1957_s10 = sld [smem:[#allocation33_spill]]  ;;  %p1958_p0 = scmp.lt.s32.totalorder %s1353_s8, 8 }
  0x72   : > { %s107_s30 = sadd.s32 1, %s1953_s18  ;;  %p114_p6 = scmp.ne.s32.totalorder %s1953_s18, %s1297_s19 }
  0x73   : > { %s1643_s20 = scalar_select %p1954_p3, %s1953_s18, %s107_s30  }
  0x74   : > { %p116_p12 = por %p114_p6, %p1955_p8  ;;  %s272_s3 = sand.u32 1, %s1953_s18  }
  0x75   : > { %s781_s1 = sshll.u32 %s272_s3, 1  ;;  %s279_s24 = scalar_lea.hbm %s1957_s10, %s1956_s9 }
  0x76   : > { %p1655_p7 = pnand %p1958_p0, %p116_p12  ;;  %s274_s26 = scalar_lea.vmem [#allocation8], %s781_s1 }
  0x77   : > { %s281_s6 = sshll.u32 %s274_s26, 4  ;;  %s1359_s18 = smov [#allocation8]   ;;  %s282_s6 = int_to_ptr.vmem [resolvable:$true] %s281_s6 }
  0x78   : > { %p1127_p2 = pneg %p1655_p7  ;;  %s1138_s27 = scalar_lea.vmem %s282_s6, 32 }
  0x79   : > { %p1139_p5 = scmp.ne.s32.totalorder %s282_s6, %s1138_s27  ;;  %s1143_s30 = sshll.u32 %s1359_s18, 4  ;;  %s1144_s30 = int_to_ptr.vmem [resolvable:$false] %s1143_s30 }
  0x7a   : > { %s1145_s3 = scalar_lea.vmem %s1144_s30, 64  ;;  %p1146_p10 = scmp.lt.s32.totalorder %s282_s6, %s1144_s30 }
  0x7b   : > { %p1141_p13 = pnand %p1139_p5, %p1127_p2  ;;  %p1147_p11 = scmp.lt.s32.totalorder %s1145_s3, %s1138_s27 }
  0x7d   : > { %p1142_p4 = pneg %p1141_p13  ;;  %p1148_p9 = por %p1147_p11, %p1146_p10 }
  0x7f   : > { %p1149_p1 = pnand %p1148_p9, %p1142_p4 }
  0x81   : > { %1152 = shalt.err (!%p1149_p1)
}
  0x82   : > { %925 = dma.hbm_to_vmem [thread:$0]  (!%p1655_p7), %s279_s24, 32, %s282_s6, %s1537_s13  }
  0x83   : > { %s1960_s10 = sshll.u32 %s1516_s4, 7  ;;  %s1961_s5 = sld [smem:[#allocation34_spill]] }
  0x84   : > { %s292_s26 = scalar_lea.vmem [#allocation9], %s1504_s17  ;;  %s1962_s27 = sand.u32 1, %s1313_s23  }
  0x85   : > { %s301_s18 = sshll.u32 %s292_s26, 4  ;;  %s289_s30 = scalar_lea.sflag [#allocation10], %s1962_s27  ;;  %s302_s18 = int_to_ptr.vmem [resolvable:$true] %s301_s18 }
  0x86   : > { %s1166_s3 = scalar_lea.vmem %s302_s18, 2048  ;;  %p1963_p3 = scmp.ne.s32.totalorder %s1937_s11, 0 }
  0x87   : > { %p1167_p6 = scmp.ne.s32.totalorder %s302_s18, %s1166_s3  ;;  %s1360_s21 = smov [#allocation9]  }
  0x88   : > { %p1964_p8 = pneg %p1963_p3  ;;  %s1171_s7 = sshll.u32 %s1360_s21, 4  ;;  %s1172_s7 = int_to_ptr.vmem [resolvable:$false] %s1171_s7 }
  0x89   : > { %s300_s15 = scalar_lea.hbm %s1961_s5, %s1960_s10  ;;  %s1173_s24 = scalar_lea.vmem %s1172_s7, 4096 }
  0x8a   : > { %p1169_p12 = pnand %p1167_p6, %p1964_p8  ;;  %p1174_p7 = scmp.lt.s32.totalorder %s302_s18, %s1172_s7 }
  0x8b   : > { %p1175_p2 = scmp.lt.s32.totalorder %s1173_s24, %s1166_s3 }
  0x8c   : > { %p1170_p0 = pneg %p1169_p12 }
  0x8d   : > { %p1176_p5 = por %p1175_p2, %p1174_p7 }
  0x8f   : > { %p1177_p13 = pnand %p1176_p5, %p1170_p0 }
  0x91   : > { %1180 = shalt.err (!%p1177_p13)
}
  0x92   : > { %s1965_s4 = smov 8   ;;  %s1966_s17 = smov 128  }
  0x93   : > { %928 = dma.hbm_to_vmem [thread:$0]  (!%p1963_p3), %s300_s15, 2048, %s302_s18, %s289_s30, %s1966_s17, %s1966_s17, %s1965_s4  }
  0x94   : > { %p1967_p4 = scmp.ne.s32.totalorder %s1950_s0, 0 }
  0x95   : > { %p1968_p10 = scmp.ne.s32.totalorder (!%p1967_p4), %s1941_s14, 0 }
  0x96   : > { %313 = sbr.rel (%p1967_p4) target bundleno = 680 (0x2a8), region = 40 }
  0x9b   : > { %1272 = dma.done.wait (%p1968_p10), [#allocation4], 128  }
  0x9c   : > { %1274 = vsyncadd (%p1968_p10), [#allocation4], 4294967168  ;;  %s319_s7 = sand.u32 1, %s1551_s16   ;;  %s321_s13 = sand.u32 1, %s1309_s22  }
  0x9d   : > { %s788_s6 = sshll.u32 %s321_s13, 7  ;;  %s320_s11 = scalar_lea.sflag [#allocation7], %s319_s7 }
  0x9e   : > { %s1688_s10 = scalar_lea.vmem [#allocation6], %s788_s6  ;;  %p1969_p11 = scmp.ne.s32.totalorder %s1942_s12, 0 }
  0xa0   : > { %1276 = dma.done.wait (%p1969_p11), %s320_s11, 2048  }
  0xa1   : > { %1278 = vsyncadd (%p1969_p11), %s320_s11, 4294965248  ;;  %s330_s0 = sand.u32 1, %s1297_s19   ;;  %p1970_p9 = scmp.ne.s32.totalorder %s1944_s2, 0 }
  0xa2   : > { %s1695_s1 = sshll.u32 %s330_s0, 1 }
  0xa3   : > { %s332_s14 = scalar_lea.vmem [#allocation8], %s1695_s1 }
  0xa4   : > { %1280 = dma.done.wait (%p1970_p9), %s320_s11, 32  }
  0xa5   : > { %1282 = vsyncadd (%p1970_p9), %s320_s11, 4294967264  ;;  %s338_s16 = scalar_lea.sflag [#allocation10], %s321_s13  ;;  %s1702_s9 = scalar_lea.vmem [#allocation9], %s788_s6 }
  0xa6   : > { %1284 = dma.done.wait (%p1969_p11), %s338_s16, 2048  }
  0xa7   : > { %1286 = vsyncadd (%p1969_p11), %s338_s16, 4294965248  ;;  %s378_s5 = sand.u32 1, %s1321_s25   ;;  %p383_p1 = scmp.lt.s32.totalorder %s1337_s29, 1 }
  0xa8   : > { %s1712_s15 = sshll.u32 %s378_s5, 3  ;;  %s1971_s18 = sld [smem:[#allocation35_spill]] }
  0xa9   : > { %s2013_s29 = smov (!%p383_p1, %s1337_s29), 1  ;;  %s380_s30 = scalar_lea.vmem [#allocation11], %s1712_s15 }
  0xaa   : > { %s1972_s12 = sld [smem:[#allocation20_spill]] }
  0xae   : > { %s385_s27 = scalar_lea.vmem %s1971_s18, %s2013_s29 }
  0xb0   : > { %p792_p6 = scmp.ne.s32.totalorder %s1972_s12, 0 }
  0xb2   : > { %389 = sbr.rel (%p792_p6) target bundleno = 185 (0xb9), region = 60 }
  0xb7   : > { %v1361_v0 = vmov 0.0  }
  0xb8   : > { %390 = vst [vmem:[#allocation2] sm:$0xff] %v1361_v0 }
  0xb9 PF: > { %v407_v1 = vld [vmem:[%s1688_s10 + $0x78] sm:$0xff]  ;;  %v1362_v2 = vmov 0.0   ;;  %vm1363_vm0 = vmmov 0   ;;  %v406_v3 = vld [vmem:[%s1688_s10 + $0x70] sm:$0xff]  ;;  %v405_v6 = vld [vmem:[%s1688_s10 + $0x68] sm:$0xff]  ;;  %s1973_s3 = sld [smem:[#allocation20_spill]] }
  0xba   : > { %835 = vmatprep.subr.mxu0 %v1362_v2  ;;  %867 = vmatprep.mubr.msk.f32.mxu0 %vm1363_vm0, %v1362_v2  ;;  %v423_v4 = vld [vmem:[%s1702_s9 + $0x78] sm:$0xff]  ;;  %v422_v5 = vld [vmem:[%s1702_s9 + $0x70] sm:$0xff]  ;;  %v421_v7 = vld [vmem:[%s1702_s9 + $0x68] sm:$0xff] }
  0xbb   : > { %836 = vmatpush3.xpose.msra.mxu0 %v407_v1  ;;  %870 = vmatprep.subr.mxu1 %v1362_v2  ;;  %v420_v8 = vld [vmem:[%s1702_s9 + $0x60] sm:$0xff]  ;;  %v419_v10 = vld [vmem:[%s1702_s9 + $0x58] sm:$0xff]  ;;  %v418_v11 = vld [vmem:[%s1702_s9 + $0x50] sm:$0xff] }
  0xbc   : > { %837 = vmatprep.subr.mxu0 %v1362_v2  ;;  %902 = vmatprep.mubr.msk.f32.mxu1 %vm1363_vm0, %v1362_v2  ;;  %v404_v9 = vld [vmem:[%s1688_s10 + $0x60] sm:$0xff]  ;;  %v403_v12 = vld [vmem:[%s1688_s10 + $0x58] sm:$0xff]  ;;  %v417_v13 = vld [vmem:[%s1702_s9 + $0x48] sm:$0xff] }
  0xbd   : > { %871 = vmatpush3.msra.mxu1 %v423_v4  ;;  %v416_v14 = vld [vmem:[%s1702_s9 + $0x40] sm:$0xff]  ;;  %v402_v15 = vld [vmem:[%s1688_s10 + $0x50] sm:$0xff]  ;;  %v415_v16 = vld [vmem:[%s1702_s9 + $0x38] sm:$0xff] }
  0xbe   : > { %872 = vmatprep.subr.mxu1 %v1362_v2  ;;  %v414_v17 = vld [vmem:[%s1702_s9 + $0x30] sm:$0xff]  ;;  %v401_v18 = vld [vmem:[%s1688_s10 + $0x48] sm:$0xff]  ;;  %v400_v21 = vld [vmem:[%s1688_s10 + $0x40] sm:$0xff] }
  0xbf   : > { %838 = vmatpush3.xpose.msra.mxu0 %v406_v3  ;;  %873 = vmatpush3.msra.mxu1 %v422_v5  ;;  %v413_v19 = vld [vmem:[%s1702_s9 + $0x28] sm:$0xff]  ;;  %v412_v20 = vld [vmem:[%s1702_s9 + $0x20] sm:$0xff]  ;;  %v411_v22 = vld [vmem:[%s1702_s9 + $0x18] sm:$0xff]  ;;  %s424_s21 = scalar_lea.vmem %s332_s14, %s1973_s3 [#allocation8]  ;;  %p794_p3 = scmp.ne.s32.totalorder %s1973_s3, 1 }
  0xc0   : > { %839 = vmatprep.subr.mxu0 %v1362_v2  ;;  %874 = vmatprep.subr.mxu1 %v1362_v2  ;;  %v399_v23 = vld [vmem:[%s1688_s10 + $0x38] sm:$0xff]  ;;  %v398_v24 = vld [vmem:[%s1688_s10 + $0x30] sm:$0xff]  ;;  %v397_v25 = vld [vmem:[%s1688_s10 + $0x28] sm:$0xff] }
  0xc1   : > { %875 = vmatpush3.msra.mxu1 %v421_v7  ;;  %v396_v26 = vld [vmem:[%s1688_s10 + $0x20] sm:$0xff]  ;;  %v395_v27 = vld [vmem:[%s1688_s10 + $0x18] sm:$0xff]  ;;  %v394_v28 = vld [vmem:[%s1688_s10 + $0x10] sm:$0xff] }
  0xc2   : > { %876 = vmatprep.subr.mxu1 %v1362_v2  ;;  %v393_v29 = vld [vmem:[%s1688_s10 + $0x8] sm:$0xff]  ;;  %v392_v30 = vld [vmem:[%s1688_s10] sm:$0xff]  ;;  %v391_v31 = vld [vmem:[#allocation3] sm:$0xff] }
  0xc3   : > { %840 = vmatpush3.xpose.msra.mxu0 %v405_v6  ;;  %877 = vmatpush3.msra.mxu1 %v420_v8  ;;  %v410_v32 = vld [vmem:[%s1702_s9 + $0x10] sm:$0xff]  ;;  %v409_v33 = vld [vmem:[%s1702_s9 + $0x8] sm:$0xff]  ;;  %v408_v34 = vld [vmem:[%s1702_s9] sm:$0xff] }
  0xc4   : > { %841 = vmatprep.subr.mxu0 %v1362_v2  ;;  %878 = vmatprep.subr.mxu1 %v1362_v2  ;;  %v793_v35 = vld [vmem:[%s424_s21] ss:$0 sm:$0xff] }
  0xc5   : > { %879 = vmatpush3.msra.mxu1 %v419_v10  ;;  %v501_v40 = vld [vmem:[#allocation2] sm:$0xff] }
  0xc6   : > { %880 = vmatprep.subr.mxu1 %v1362_v2 }
  0xc7   : > { %842 = vmatpush3.xpose.msra.mxu0 %v404_v9  ;;  %881 = vmatpush3.msra.mxu1 %v418_v11 }
  0xc8   : > { %843 = vmatprep.subr.mxu0 %v1362_v2  ;;  %882 = vmatprep.subr.mxu1 %v1362_v2 }
  0xc9   : > { %883 = vmatpush3.msra.mxu1 %v417_v13 }
  0xca   : > { %884 = vmatprep.subr.mxu1 %v1362_v2 }
  0xcb   : > { %844 = vmatpush3.xpose.msra.mxu0 %v403_v12  ;;  %885 = vmatpush3.msra.mxu1 %v416_v14 }
  0xcc   : > { %845 = vmatprep.subr.mxu0 %v1362_v2  ;;  %886 = vmatprep.subr.mxu1 %v1362_v2 }
  0xcd   : > { %887 = vmatpush3.msra.mxu1 %v415_v16 }
  0xce   : > { %888 = vmatprep.subr.mxu1 %v1362_v2 }
  0xcf   : > { %846 = vmatpush3.xpose.msra.mxu0 %v402_v15  ;;  %889 = vmatpush3.msra.mxu1 %v414_v17 }
  0xd0   : > { %847 = vmatprep.subr.mxu0 %v1362_v2  ;;  %890 = vmatprep.subr.mxu1 %v1362_v2 }
  0xd1   : > { %891 = vmatpush3.msra.mxu1 %v413_v19 }
  0xd2   : > { %892 = vmatprep.subr.mxu1 %v1362_v2 }
  0xd3   : > { %848 = vmatpush3.xpose.msra.mxu0 %v401_v18  ;;  %893 = vmatpush3.msra.mxu1 %v412_v20 }
  0xd4   : > { %849 = vmatprep.subr.mxu0 %v1362_v2  ;;  %894 = vmatprep.subr.mxu1 %v1362_v2 }
  0xd5   : > { %895 = vmatpush3.msra.mxu1 %v411_v22 }
  0xd6   : > { %896 = vmatprep.subr.mxu1 %v1362_v2 }
  0xd7   : > { %850 = vmatpush3.xpose.msra.mxu0 %v400_v21  ;;  %897 = vmatpush3.msra.mxu1 %v410_v32 }
  0xd8   : > { %851 = vmatprep.subr.mxu0 %v1362_v2  ;;  %898 = vmatprep.subr.mxu1 %v1362_v2 }
  0xd9   : > { %899 = vmatpush3.msra.mxu1 %v409_v33 }
  0xda   : > { %900 = vmatprep.subr.mxu1 %v1362_v2 }
  0xdb   : > { %852 = vmatpush3.xpose.msra.mxu0 %v399_v23  ;;  %901 = vmatpush3.msra.mxu1 %v408_v34 }
  0xdc   : > { %853 = vmatprep.subr.mxu0 %v1362_v2 }
  0xdf   : > { %854 = vmatpush3.xpose.msra.mxu0 %v398_v24 }
  0xe0   : > { %855 = vmatprep.subr.mxu0 %v1362_v2 }
  0xe3   : > { %856 = vmatpush3.xpose.msra.mxu0 %v397_v25 }
  0xe4   : > { %857 = vmatprep.subr.mxu0 %v1362_v2 }
  0xe7   : > { %858 = vmatpush3.xpose.msra.mxu0 %v396_v26 }
  0xe8   : > { %859 = vmatprep.subr.mxu0 %v1362_v2 }
  0xeb   : > { %860 = vmatpush3.xpose.msra.mxu0 %v395_v27 }
  0xec   : > { %861 = vmatprep.subr.mxu0 %v1362_v2 }
  0xef   : > { %862 = vmatpush3.xpose.msra.mxu0 %v394_v28 }
  0xf0   : > { %863 = vmatprep.subr.mxu0 %v1362_v2 }
  0xf3   : > { %864 = vmatpush3.xpose.msra.mxu0 %v393_v29 }
  0xf4   : > { %865 = vmatprep.subr.mxu0 %v1362_v2 }
  0xf7   : > { %866 = vmatpush3.xpose.msra.mxu0 %v392_v30 }
  0xfa   : > { %868 = vmatmul.mubr.f32.vlgmr.msra.gmra.mxu0 %v391_v31 }
 0x1ba   : > { %v496_v36 = vpop.f32.mrf.mxu0 }
 0x1bb   : > { %v497_v37 = vadd.f32 %v793_v35, %v496_v36 }
 0x1bc   : > { %v869_v38 = vpop.f32.mrf.mxu0 }
 0x1bd   : > { %v500_v39 = vmax.f32 %v497_v37, 0.0 }
 0x1bf   : > { %903 = vmatmul.mubr.f32.vlgmr.msra.gmra.mxu1 %v500_v39 }
 0x27e   : > { %577 = sbr.rel (%p794_p3) target bundleno = 653 (0x28d), region = 64 }
 0x27f   : > { %v568_v41 = vpop.f32.mrf.mxu1 }
 0x280   : > { %v572_v42 = vadd.f32 %v568_v41, %v501_v40 }
 0x281   : > { %v904_v43 = vpop.f32.mrf.mxu1 }
 0x282   : > { %573 = vst [vmem:[#allocation2] sm:$0xff] %v572_v42 }
 0x283   : > { %v795_v44 = vld [vmem:[%s385_s27] ss:$0 sm:$0xff] }
 0x289   : > { %v579_v45 = vld [vmem:[#allocation2] sm:$0xff] }
 0x28a   : > { %v586_v46 = vadd.f32 %v795_v44, %v579_v45 }
 0x28c   : > { %587 = vst [vmem:[%s380_s30] sm:$0xff] %v586_v46 }
 0x28d PF: > { %s1975_s7 = sshll.u32 %s1610_s28, 7  ;;  %s1976_s11 = sld [smem:[#allocation36_spill]] }
 0x28e   : > { %s1977_s10 = sld [smem:[#allocation21_spill]]  ;;  %s604_s1 = sshll.u32 %s380_s30, 4  ;;  %s605_s1 = int_to_ptr.vmem [resolvable:$true] %s604_s1 }
 0x28f   : > { %s589_s29 = scalar_lea.sflag [#allocation5], %s378_s5  ;;  %s1181_s14 = scalar_lea.vmem %s605_s1, 128 }
 0x290   : > { %p1182_p8 = scmp.ne.s32.totalorder %s605_s1, %s1181_s14  ;;  %s1364_s16 = smov [#allocation11]  }
 0x291   : > { %s1185_s9 = sshll.u32 %s1364_s16, 4  ;;  %s1186_s9 = int_to_ptr.vmem [resolvable:$false] %s1185_s9 }
 0x292   : > { %s1187_s28 = scalar_lea.vmem %s1186_s9, 256  ;;  %p1188_p2 = scmp.lt.s32.totalorder %s605_s1, %s1186_s9 }
 0x293   : > { %s602_s0 = scalar_lea.hbm %s1976_s11, %s1975_s7  ;;  %p1189_p5 = scmp.lt.s32.totalorder %s1187_s28, %s1181_s14 }
 0x294   : > { %p1978_p12 = scmp.ne.s32.totalorder %s1977_s10, 0 }
 0x295   : > { %p1190_p13 = por %p1189_p5, %p1188_p2 }
 0x296   : > { %p1183_p0 = pnand %p1182_p8, %p1978_p12 }
 0x298   : > { %p1184_p7 = pneg %p1183_p0 }
 0x29a   : > { %p1191_p4 = pnand %p1190_p13, %p1184_p7 }
 0x29c   : > { %1194 = shalt.err (!%p1191_p4)
}
 0x29d   : > { %s1195_s2 = scalar_lea.hbm %s602_s0, 128  ;;  %s1199_s26 = scalar_lea.hbm %s1976_s11, 512 }
 0x29e   : > { %p1196_p10 = scmp.ne.s32.totalorder %s602_s0, %s1195_s2  ;;  %p1200_p1 = scmp.lt.s32.totalorder %s602_s0, %s1976_s11 }
 0x29f   : > { %p1201_p6 = scmp.lt.s32.totalorder %s1199_s26, %s1195_s2 }
 0x2a0   : > { %p1197_p11 = pnand %p1196_p10, %p1978_p12 }
 0x2a1   : > { %p1202_p3 = por %p1201_p6, %p1200_p1 }
 0x2a2   : > { %p1198_p9 = pneg %p1197_p11 }
 0x2a4   : > { %p1203_p8 = pnand %p1202_p3, %p1198_p9 }
 0x2a6   : > { %1206 = shalt.err (!%p1203_p8)
}
 0x2a7   : > { %913 = dma.vmem_to_hbm [thread:$0]  (%p1978_p12), %s605_s1, 128, %s602_s0, %s589_s29  }
 0x2a8 PF: > { %s1979_s30 = sld [smem:[#allocation18_spill]]  ;;  %p934_p0 = scmp.ge.s32.totalorder %s1353_s8, 2 }
 0x2a9   : > { %s1980_s12 = sld [smem:[#allocation30_spill]] }
 0x2ae   : > { %s616_s3 = sand.u32 1, %s1979_s30  }
 0x2af   : > { %p1981_p7 = scmp.ne.s32.totalorder %s1980_s12, 0  ;;  %s617_s21 = scalar_lea.sflag [#allocation5], %s616_s3 }
 0x2b1   : > { %p930_p2 = pnand %p934_p0, %p1981_p7 }
 0x2b3   : > { %p931_p5 = pneg %p930_p2 }
 0x2b5   : > { %1288 = dma.done.wait (%p931_p5), %s617_s21, 128  }
 0x2b6   : > { %1290 = vsyncadd (%p931_p5), %s617_s21, 4294967168  ;;  %s25_s8 = sadd.s32 1, %s1353_s8   ;;  %s1983_s4 = sld [smem:[#allocation17_spill]] }
 0x2b7   : > { %p1826_p13 = scmp.ge.s32.totalorder %s25_s8, 10   ;;  %s1984_s17 = sld [smem:[#allocation27_spill]] }
 0x2b8   : > { %s1985_s7 = sld [smem:[#allocation19_spill]]  ;;  %s1993_s18 = smov %s1297_s19 }
 0x2b9   : > { %s1986_s26 = sld [smem:[#allocation29_spill]]  ;;  %s1996_s21 = smov %s1309_s22 }
 0x2ba   : > { %s1987_s27 = sld [smem:[#allocation22_spill]]  ;;  %s1997_s22 = smov %s1313_s23 }
 0x2bb   : > { %s1988_s28 = sld [smem:[#allocation23_spill]]  ;;  %s1999_s24 = smov %s1321_s25 }
 0x2bc   : > { %s1989_s29 = sld [smem:[#allocation24_spill]]  ;;  %s1995_s19 = smov %s1983_s4 }
 0x2bd   : > { %s1990_s30 = sld [smem:[#allocation25_spill]]  ;;  %s1998_s23 = smov %s1984_s17 }
 0x2be   : > { %s1991_s6 = sld [smem:[#allocation28_spill]]  ;;  %s2000_s25 = smov %s1985_s7 }
 0x2bf   : > { %s1992_s13 = sld [smem:[#allocation26_spill]] }
 0x2c1   :  { %24 = sbr.rel (!%p1826_p13) target bundleno = 21 (0x15), region = 127 }
 0x2c5   : > { %s2001_s7 = smov %s1992_s13 }
 0x2c6   :  { %622 = vsyncpa [#allocation4], 1 }
 0x2c7   :  { %624 = vsyncpa [#allocation4 + $0x1], 1 }
 0x2c8   :  { %625 = vsyncpa [#allocation7], 1 }
 0x2c9   :  { %627 = vsyncpa [#allocation7 + $0x1], 1 }
 0x2ca   :  { %628 = vsyncpa [#allocation10], 1 }
 0x2cb   :  { %630 = vsyncpa [#allocation10 + $0x1], 1 }
 0x2cc   :  { %631 = vsyncpa [#allocation5], 1 }
 0x2cd   :  { %633 = vsyncpa [#allocation5 + $0x1], 1 }

</bundles_post_ra>
